<compile_context>
chip_gen: v7x
topology: tpu7x:2x2x1
jax: 0.10.0
libtpu: 0.0.40
codegen_flags: <defaults>
</compile_context>

<pallas_src>
import jax
import jax.numpy as jnp
from jax.experimental import pallas as pl
from jax.experimental.pallas import tpu as pltpu


def _round_up(x, m):
    return (x + m - 1) // m * m


def _relu_dense(x, w_ref, b_ref):
    """x @ W + b: MXU push in the weight dtype, f32 accumulate, f32 bias+ReLU."""
    y = jnp.dot(x.astype(w_ref.dtype), w_ref[...],
                preferred_element_type=jnp.float32) + b_ref[...]
    return jnp.maximum(y, 0.0)


def _final_row(g1, wv2t_ref, bv2_ref):
    """Final N=1 layer as a lane-dense (1, TB) row.

    (1, H1) contracted against (TB, H1) on its last dim -> (1, TB); only
    TB/128 MXU pushes and the output store is an unmasked full-lane vst
    instead of TB/8 masked single-lane stores.
    """
    r = jnp.einsum('oh,bh->ob', wv2t_ref[...], g1,
                   preferred_element_type=jnp.float32)
    return r + bv2_ref[...]


def _fwd_kernel_merged(sx_ref, p1_ref, p2_ref,
                       we0_ref, be0_ref,
                       wc_ref, bv0_ref,
                       wv1_ref, bv1_ref,
                       wv2t_ref, bv2_ref,
                       out_ref):
    # Shared embedding hidden layer, run once per parameter stream
    # (no in-kernel batch concat; push count identical for TB >= 8).
    h1 = _relu_dense(p1_ref[...], we0_ref, be0_ref)
    h2 = _relu_dense(p2_ref[...], we0_ref, be0_ref)

    # Linear embedding head is pre-fused into wc/bv0 in the wrapper, so eval
    # layer 0 is ONE dot with K = 2S + 2*EH <= 128 (a single K tile).
    cd = wc_ref.dtype
    z = jnp.concatenate(
        [sx_ref[...].astype(cd), h1.astype(cd), h2.astype(cd)], axis=-1)
    g0 = _relu_dense(z, wc_ref, bv0_ref)
    g1 = _relu_dense(g0, wv1_ref, bv1_ref)

    out_ref[...] = _final_row(g1, wv2t_ref, bv2_ref)[None]   # (1, 1, TB)


def _fwd_kernel_split(sx_ref, p1_ref, p2_ref,
                      we0_ref, be0_ref,
                      wv0s_ref, wc1_ref, wc2_ref, bv0_ref,
                      wv1_ref, bv1_ref,
                      wv2t_ref, bv2_ref,
                      out_ref):
    # Used only when 2S + 2*EH > 128: merging would not reduce K tiles, so the
    # split avoids the z-assembly copy.
    f32 = jnp.float32
    h1 = _relu_dense(p1_ref[...], we0_ref, be0_ref)
    h2 = _relu_dense(p2_ref[...], we0_ref, be0_ref)

    g0 = (jnp.dot(sx_ref[...].astype(wv0s_ref.dtype), wv0s_ref[...],
                  preferred_element_type=f32)
          + jnp.dot(h1.astype(wc1_ref.dtype), wc1_ref[...],
                    preferred_element_type=f32)
          + jnp.dot(h2.astype(wc2_ref.dtype), wc2_ref[...],
                    preferred_element_type=f32)
          + bv0_ref[...])
    g0 = jnp.maximum(g0, 0.0)
    g1 = _relu_dense(g0, wv1_ref, bv1_ref)

    out_ref[...] = _final_row(g1, wv2t_ref, bv2_ref)[None]   # (1, 1, TB)


def pcvf_forward(states_1, states_2, mlp_parameters_1, mlp_parameters_2, params,
                 *, batch_tile=4096, compute_dtype=jnp.bfloat16):
    """Pallas equivalent of ComparingStatePolicyConditionedValueFunction.forward.

    compute_dtype quantizes the streamed inputs and matmul weights (accumulation,
    bias add and ReLU stay f32).  With the default bf16, expect ~1e-2-level
    absolute differences vs an f32 reference; pass jnp.float32 for tighter
    agreement.
    """
    (we0, be0, we1, be1, wv0, bv0, wv1, bv1, wv2, bv2) = params
    B, S = states_1.shape
    P = mlp_parameters_1.shape[1]
    EH = we0.shape[1]
    E = we1.shape[1]
    H0 = wv0.shape[1]
    H1 = wv1.shape[1]
    f32 = jnp.float32
    cd = jnp.dtype(compute_dtype)

    # ---- wrapper-side algebra: fuse the linear embedding head into eval L0 ---
    wv0_s = wv0[:2 * S, :]                     # (2S, H0)
    wv0_e1 = wv0[2 * S:2 * S + E, :]           # (E,  H0)
    wv0_e2 = wv0[2 * S + E:, :]                # (E,  H0)
    wc1 = we1 @ wv0_e1                         # (EH, H0)
    wc2 = we1 @ wv0_e2                         # (EH, H0)
    bv0_fused = bv0 + be1 @ wv0_e1 + be1 @ wv0_e2

    sx = jnp.concatenate([states_1, states_2], axis=1).astype(cd)   # (B, 2S)
    p1 = mlp_parameters_1.astype(cd)
    p2 = mlp_parameters_2.astype(cd)

    we0c = we0.astype(cd)
    wv1c = wv1.astype(cd)
    be0f = be0.astype(f32)
    bv0f = bv0_fused.astype(f32)
    bv1f = bv1.astype(f32)
    bv2f = bv2.astype(f32)
    wv2t = wv2.T.astype(f32)                   # (1, H1) — tiny, keep f32

    k_comb = 2 * S + 2 * EH
    if k_comb <= 128:
        wcomb = jnp.concatenate([wv0_s, wc1, wc2], axis=0).astype(cd)
        weights = (we0c, be0f, wcomb, bv0f, wv1c, bv1f, wv2t, bv2f)
        kernel = _fwd_kernel_merged
    else:
        weights = (we0c, be0f, wv0_s.astype(cd), wc1.astype(cd), wc2.astype(cd),
                   bv0f, wv1c, bv1f, wv2t, bv2f)
        kernel = _fwd_kernel_split

    # ---- batch tile sizing ---------------------------------------------------
    itemsize = cd.itemsize
    bytes_per_row = (2 * S + 2 * P) * itemsize + 4      # streamed in + f32 out
    weight_bytes = sum(int(w.size) * w.dtype.itemsize for w in weights)
    # Conservative budget that fits the default scoped VMEM on v5e/v6e/v7x, so
    # no vmem_limit_bytes request is needed (review: never ask for all of v7x's
    # 64 MiB).  Weights counted twice (default double buffering).
    VMEM_BUDGET = 16 << 20
    avail = max(VMEM_BUDGET - 2 * weight_bytes, 1 << 20)
    tb_vmem = max(8, (avail // (2 * bytes_per_row)) // 8 * 8)
    tb_cap = max(8, min(_round_up(batch_tile, 8), tb_vmem, 4096))

    num_tiles = pl.cdiv(B, tb_cap)
    if B >= 16 and num_tiles == 1:
        num_tiles = 2                 # give both v7x TensorCores work
    TB = _round_up(pl.cdiv(B, num_tiles), 8)
    num_tiles = pl.cdiv(B, TB)
    B_pad = num_tiles * TB
    if B_pad != B:
        pad = ((0, B_pad - B), (0, 0))
        sx = jnp.pad(sx, pad)
        p1 = jnp.pad(p1, pad)
        p2 = jnp.pad(p2, pad)

    row = lambda i: (i, 0)            # batch-tiled streamed inputs
    whole = lambda i: (0, 0)          # weights/biases: resident across steps
    # NOTE: pipeline_mode=pl.Buffered(1) on the weight specs would halve their
    # resident VMEM at large widths; omitted here (immaterial at these dims).

    in_specs = [pl.BlockSpec((TB, 2 * S), row),
                pl.BlockSpec((TB, P), row),
                pl.BlockSpec((TB, P), row)]
    in_specs += [pl.BlockSpec(w.shape, whole) for w in weights]
    out_spec = pl.BlockSpec((1, 1, TB), lambda i: (i, 0, 0))   # lane-dense rows

    # Advisory cost estimate (computed from the padded batch).
    flops = 2 * B_pad * (2 * P * EH + k_comb * H0 + H0 * H1 + H1)
    bytes_accessed = (B_pad * (2 * S + 2 * P) * itemsize
                      + weight_bytes + B_pad * 4)
    cost = pl.CostEstimate(flops=int(flops), transcendentals=0,
                           bytes_accessed=int(bytes_accessed))

    out = pl.pallas_call(
        kernel,
        out_shape=jax.ShapeDtypeStruct((num_tiles, 1, TB), f32),
        grid=(num_tiles,),
        in_specs=in_specs,
        out_specs=out_spec,
        compiler_params=pltpu.CompilerParams(
            dimension_semantics=("parallel",)),
        cost_estimate=cost,
    )(sx, p1, p2, *weights)

    return out.reshape(B_pad, 1)[:B]


# ------------------------------------------------------------------------------
# deterministic parameter construction (synthetic weights, no checkpoint load)
# ------------------------------------------------------------------------------
def _linear_init(key, fan_in, fan_out):
    kw, kb = jax.random.split(key)
    scale = 1.0 / jnp.sqrt(jnp.float32(fan_in))
    w = jax.random.uniform(kw, (fan_in, fan_out), jnp.float32, -scale, scale)
    b = jax.random.uniform(kb, (1, fan_out), jnp.float32, -scale, scale)
    return w, b


def init_params(key, param_dim, embed_hidden, embed_size, state_size, eval_hidden):
    ks = jax.random.split(key, 5)
    # embedding net: [param_dim, embed_hidden, embed_size]
    we0, be0 = _linear_init(ks[0], param_dim, embed_hidden)
    we1, be1 = _linear_init(ks[1], embed_hidden, embed_size)
    # evaluation net: [(embed_size + state_size) * 2, *eval_hidden, 1]
    d_in = (embed_size + state_size) * 2
    wv0, bv0 = _linear_init(ks[2], d_in, eval_hidden[0])
    wv1, bv1 = _linear_init(ks[3], eval_hidden[0], eval_hidden[1])
    wv2, bv2 = _linear_init(ks[4], eval_hidden[1], 1)
    return (we0, be0, we1, be1, wv0, bv0, wv1, bv1, wv2, bv2)


def _reference_forward(s1, s2, p1, p2, params):
    """Pure-JAX reference matching the PyTorch module semantics."""
    (we0, be0, we1, be1, wv0, bv0, wv1, bv1, wv2, bv2) = params

    def embed(p):
        h = jnp.maximum(p @ we0 + be0, 0.0)
        return h @ we1 + be1

    e1, e2 = embed(p1), embed(p2)
    z = jnp.concatenate([s1, s2, e1, e2], axis=1)   # torch.hstack
    h = jnp.maximum(z @ wv0 + bv0, 0.0)
    h = jnp.maximum(h @ wv1 + bv1, 0.0)
    return h @ wv2 + bv2


if __name__ == "__main__":
    key = jax.random.PRNGKey(0)
    B = 4            # batch
    S = 16           # state_size
    P = 64           # flattened mlp_parameters dimension (embedding net input)
    EH = 32          # embedding net hidden width
    E = 24           # embedding_net.embedding_size
    EVAL_HIDDEN = [32, 16]

    k_s1, k_s2, k_p1, k_p2, k_w = jax.random.split(key, 5)
    states_1 = jax.random.normal(k_s1, (B, S), jnp.float32)
    states_2 = jax.random.normal(k_s2, (B, S), jnp.float32)
    mlp_parameters_1 = jax.random.normal(k_p1, (B, P), jnp.float32)
    mlp_parameters_2 = jax.random.normal(k_p2, (B, P), jnp.float32)

    params = init_params(k_w, P, EH, E, S, EVAL_HIDDEN)
    ref = _reference_forward(states_1, states_2, mlp_parameters_1,
                             mlp_parameters_2, params)

    # f32 compute path.  The embedding-head fusion is exact in real arithmetic;
    # the tolerance covers the changed summation association plus TPU default
    # matmul precision for f32 dots.
    out_f32 = jax.block_until_ready(
        pcvf_forward(states_1, states_2, mlp_parameters_1, mlp_parameters_2,
                     params, compute_dtype=jnp.float32))
    assert out_f32.shape == (B, 1), out_f32.shape
    assert out_f32.dtype == jnp.float32
    assert bool(jnp.all(jnp.isfinite(out_f32)))
    assert jnp.allclose(out_f32, ref, atol=2e-2, rtol=2e-2), (out_f32, ref)

    # Default path (bf16 MXU operands, f32 accumulate) — quantized, loose check.
    out_bf16 = jax.block_until_ready(
        pcvf_forward(states_1, states_2, mlp_parameters_1, mlp_parameters_2,
                     params))
    assert out_bf16.shape == (B, 1), out_bf16.shape
    assert bool(jnp.all(jnp.isfinite(out_bf16)))
    assert jnp.allclose(out_bf16, ref, atol=2.5e-1, rtol=1e-1), (out_bf16, ref)

    print("KERNEL_OK")
</pallas_src>

<mosaic_0001>
module attributes {stable_mosaic.version = 11 : i64} {
  func.func @_fwd_kernel_merged(%arg0: i32, %arg1: memref<8x32xf32, #tpu.memory_space<vmem>>, %arg2: memref<8x64xf32, #tpu.memory_space<vmem>>, %arg3: memref<8x64xf32, #tpu.memory_space<vmem>>, %arg4: memref<64x32xf32, #tpu.memory_space<vmem>>, %arg5: memref<1x32xf32, #tpu.memory_space<vmem>>, %arg6: memref<96x32xf32, #tpu.memory_space<vmem>>, %arg7: memref<1x32xf32, #tpu.memory_space<vmem>>, %arg8: memref<32x16xf32, #tpu.memory_space<vmem>>, %arg9: memref<1x16xf32, #tpu.memory_space<vmem>>, %arg10: memref<1x16xf32, #tpu.memory_space<vmem>>, %arg11: memref<1x1xf32, #tpu.memory_space<vmem>>, %arg12: memref<1x1x8xf32, #tpu.memory_space<vmem>>) attributes {dimension_semantics = [#tpu.dimension_semantics<parallel>], iteration_bounds = array<i64: 1>, scalar_prefetch = 0 : i64, scratch_operands = 0 : i64, tpu.core_type = #tpu.core_type<tc>, window_params = [{transform_indices = @transform_0, window_bounds = array<i64: 8, 32>}, {transform_indices = @transform_1, window_bounds = array<i64: 8, 64>}, {transform_indices = @transform_2, window_bounds = array<i64: 8, 64>}, {pipeline_mode = #tpu.pipeline_mode<synchronous>, transform_indices = @transform_3, window_bounds = array<i64: 64, 32>}, {pipeline_mode = #tpu.pipeline_mode<synchronous>, transform_indices = @transform_4, window_bounds = array<i64: 1, 32>}, {pipeline_mode = #tpu.pipeline_mode<synchronous>, transform_indices = @transform_5, window_bounds = array<i64: 96, 32>}, {pipeline_mode = #tpu.pipeline_mode<synchronous>, transform_indices = @transform_6, window_bounds = array<i64: 1, 32>}, {pipeline_mode = #tpu.pipeline_mode<synchronous>, transform_indices = @transform_7, window_bounds = array<i64: 32, 16>}, {pipeline_mode = #tpu.pipeline_mode<synchronous>, transform_indices = @transform_8, window_bounds = array<i64: 1, 16>}, {pipeline_mode = #tpu.pipeline_mode<synchronous>, transform_indices = @transform_9, window_bounds = array<i64: 1, 16>}, {pipeline_mode = #tpu.pipeline_mode<synchronous>, transform_indices = @transform_10, window_bounds = array<i64: 1, 1>}, {transform_indices = @transform_11, window_bounds = array<i64: 1, 1, 8>}]} {
    %c0 = arith.constant 0 : index
    %c0_0 = arith.constant 0 : index
    %0 = vector.load %arg2[%c0, %c0_0] : memref<8x64xf32, #tpu.memory_space<vmem>>, vector<8x64xf32>
    %c0_1 = arith.constant 0 : index
    %c0_2 = arith.constant 0 : index
    %1 = vector.load %arg4[%c0_1, %c0_2] : memref<64x32xf32, #tpu.memory_space<vmem>>, vector<64x32xf32>
    %cst = arith.constant dense<0.000000e+00> : vector<8x32xf32>
    %2 = tpu.matmul %0, %1, %cst {dimension_numbers = #tpu.dot_dimension_numbers<[1], [0], [0], [1], [0, 0, 1, 1], [], []>} : vector<8x64xf32>, vector<64x32xf32>, vector<8x32xf32> -> vector<8x32xf32>
    %c0_3 = arith.constant 0 : index
    %c0_4 = arith.constant 0 : index
    %3 = vector.load %arg5[%c0_3, %c0_4] : memref<1x32xf32, #tpu.memory_space<vmem>>, vector<1x32xf32>
    %4 = vector.broadcast %3 : vector<1x32xf32> to vector<8x32xf32>
    %5 = arith.addf %2, %4 : vector<8x32xf32>
    %cst_5 = arith.constant 0.000000e+00 : f32
    %6 = vector.broadcast %cst_5 : f32 to vector<8x32xf32>
    %7 = arith.maximumf %5, %6 : vector<8x32xf32>
    %c0_6 = arith.constant 0 : index
    %c0_7 = arith.constant 0 : index
    %8 = vector.load %arg3[%c0_6, %c0_7] : memref<8x64xf32, #tpu.memory_space<vmem>>, vector<8x64xf32>
    %c0_8 = arith.constant 0 : index
    %c0_9 = arith.constant 0 : index
    %9 = vector.load %arg4[%c0_8, %c0_9] : memref<64x32xf32, #tpu.memory_space<vmem>>, vector<64x32xf32>
    %cst_10 = arith.constant dense<0.000000e+00> : vector<8x32xf32>
    %10 = tpu.matmul %8, %9, %cst_10 {dimension_numbers = #tpu.dot_dimension_numbers<[1], [0], [0], [1], [0, 0, 1, 1], [], []>} : vector<8x64xf32>, vector<64x32xf32>, vector<8x32xf32> -> vector<8x32xf32>
    %c0_11 = arith.constant 0 : index
    %c0_12 = arith.constant 0 : index
    %11 = vector.load %arg5[%c0_11, %c0_12] : memref<1x32xf32, #tpu.memory_space<vmem>>, vector<1x32xf32>
    %12 = vector.broadcast %11 : vector<1x32xf32> to vector<8x32xf32>
    %13 = arith.addf %10, %12 : vector<8x32xf32>
    %cst_13 = arith.constant 0.000000e+00 : f32
    %14 = vector.broadcast %cst_13 : f32 to vector<8x32xf32>
    %15 = arith.maximumf %13, %14 : vector<8x32xf32>
    %c0_14 = arith.constant 0 : index
    %c0_15 = arith.constant 0 : index
    %16 = vector.load %arg1[%c0_14, %c0_15] : memref<8x32xf32, #tpu.memory_space<vmem>>, vector<8x32xf32>
    %17 = tpu.concatenate %16, %7, %15 in 1 : vector<8x32xf32>, vector<8x32xf32>, vector<8x32xf32> -> vector<8x96xf32>
    %c0_16 = arith.constant 0 : index
    %c0_17 = arith.constant 0 : index
    %18 = vector.load %arg6[%c0_16, %c0_17] : memref<96x32xf32, #tpu.memory_space<vmem>>, vector<96x32xf32>
    %cst_18 = arith.constant dense<0.000000e+00> : vector<8x32xf32>
    %19 = tpu.matmul %17, %18, %cst_18 {dimension_numbers = #tpu.dot_dimension_numbers<[1], [0], [0], [1], [0, 0, 1, 1], [], []>} : vector<8x96xf32>, vector<96x32xf32>, vector<8x32xf32> -> vector<8x32xf32>
    %c0_19 = arith.constant 0 : index
    %c0_20 = arith.constant 0 : index
    %20 = vector.load %arg7[%c0_19, %c0_20] : memref<1x32xf32, #tpu.memory_space<vmem>>, vector<1x32xf32>
    %21 = vector.broadcast %20 : vector<1x32xf32> to vector<8x32xf32>
    %22 = arith.addf %19, %21 : vector<8x32xf32>
    %cst_21 = arith.constant 0.000000e+00 : f32
    %23 = vector.broadcast %cst_21 : f32 to vector<8x32xf32>
    %24 = arith.maximumf %22, %23 : vector<8x32xf32>
    %c0_22 = arith.constant 0 : index
    %c0_23 = arith.constant 0 : index
    %25 = vector.load %arg8[%c0_22, %c0_23] : memref<32x16xf32, #tpu.memory_space<vmem>>, vector<32x16xf32>
    %cst_24 = arith.constant dense<0.000000e+00> : vector<8x16xf32>
    %26 = tpu.matmul %24, %25, %cst_24 {dimension_numbers = #tpu.dot_dimension_numbers<[1], [0], [0], [1], [0, 0, 1, 1], [], []>} : vector<8x32xf32>, vector<32x16xf32>, vector<8x16xf32> -> vector<8x16xf32>
    %c0_25 = arith.constant 0 : index
    %c0_26 = arith.constant 0 : index
    %27 = vector.load %arg9[%c0_25, %c0_26] : memref<1x16xf32, #tpu.memory_space<vmem>>, vector<1x16xf32>
    %28 = vector.broadcast %27 : vector<1x16xf32> to vector<8x16xf32>
    %29 = arith.addf %26, %28 : vector<8x16xf32>
    %cst_27 = arith.constant 0.000000e+00 : f32
    %30 = vector.broadcast %cst_27 : f32 to vector<8x16xf32>
    %31 = arith.maximumf %29, %30 : vector<8x16xf32>
    %c0_28 = arith.constant 0 : index
    %c0_29 = arith.constant 0 : index
    %32 = vector.load %arg10[%c0_28, %c0_29] : memref<1x16xf32, #tpu.memory_space<vmem>>, vector<1x16xf32>
    "tpu.trace_start"() <{level = 10 : i32, message = "oh,bh->ob"}> : () -> ()
    %cst_30 = arith.constant dense<0.000000e+00> : vector<1x8xf32>
    %33 = tpu.matmul %32, %31, %cst_30 {dimension_numbers = #tpu.dot_dimension_numbers<[1], [1], [0], [0], [0, 0, 1, 0], [], []>} : vector<1x16xf32>, vector<8x16xf32>, vector<1x8xf32> -> vector<1x8xf32>
    "tpu.trace_stop"() : () -> ()
    %c0_31 = arith.constant 0 : index
    %c0_32 = arith.constant 0 : index
    %34 = vector.load %arg11[%c0_31, %c0_32] : memref<1x1xf32, #tpu.memory_space<vmem>>, vector<1x1xf32>
    %35 = vector.broadcast %34 : vector<1x1xf32> to vector<1x8xf32>
    %36 = arith.addf %33, %35 : vector<1x8xf32>
    %37 = vector.shape_cast %36 : vector<1x8xf32> to vector<1x1x8xf32>
    %c0_33 = arith.constant 0 : index
    %c0_34 = arith.constant 0 : index
    %c0_35 = arith.constant 0 : index
    %38 = vector.load %arg12[%c0_33, %c0_34, %c0_35] : memref<1x1x8xf32, #tpu.memory_space<vmem>>, vector<1x1x8xf32>
    tpu.vector_store %arg12[%c0_33, %c0_34, %c0_35], %37 {strides = array<i32>} : memref<1x1x8xf32, #tpu.memory_space<vmem>>, vector<1x1x8xf32>,
    return
  }
  func.func @transform_0(%arg0: i32) -> (i32, i32) {
    %c0_i32 = arith.constant 0 : i32
    %c0_i32_0 = arith.constant 0 : i32
    return %arg0, %c0_i32 : i32, i32
  }
  func.func @transform_1(%arg0: i32) -> (i32, i32) {
    %c0_i32 = arith.constant 0 : i32
    %c0_i32_0 = arith.constant 0 : i32
    return %arg0, %c0_i32 : i32, i32
  }
  func.func @transform_2(%arg0: i32) -> (i32, i32) {
    %c0_i32 = arith.constant 0 : i32
    %c0_i32_0 = arith.constant 0 : i32
    return %arg0, %c0_i32 : i32, i32
  }
  func.func @transform_3(%arg0: i32) -> (i32, i32) {
    %c0_i32 = arith.constant 0 : i32
    %c0_i32_0 = arith.constant 0 : i32
    %c0_i32_1 = arith.constant 0 : i32
    return %c0_i32, %c0_i32_0 : i32, i32
  }
  func.func @transform_4(%arg0: i32) -> (i32, i32) {
    %c0_i32 = arith.constant 0 : i32
    %c0_i32_0 = arith.constant 0 : i32
    %c0_i32_1 = arith.constant 0 : i32
    return %c0_i32, %c0_i32_0 : i32, i32
  }
  func.func @transform_5(%arg0: i32) -> (i32, i32) {
    %c0_i32 = arith.constant 0 : i32
    %c0_i32_0 = arith.constant 0 : i32
    %c0_i32_1 = arith.constant 0 : i32
    return %c0_i32, %c0_i32_0 : i32, i32
  }
  func.func @transform_6(%arg0: i32) -> (i32, i32) {
    %c0_i32 = arith.constant 0 : i32
    %c0_i32_0 = arith.constant 0 : i32
    %c0_i32_1 = arith.constant 0 : i32
    return %c0_i32, %c0_i32_0 : i32, i32
  }
  func.func @transform_7(%arg0: i32) -> (i32, i32) {
    %c0_i32 = arith.constant 0 : i32
    %c0_i32_0 = arith.constant 0 : i32
    %c0_i32_1 = arith.constant 0 : i32
    return %c0_i32, %c0_i32_0 : i32, i32
  }
  func.func @transform_8(%arg0: i32) -> (i32, i32) {
    %c0_i32 = arith.constant 0 : i32
    %c0_i32_0 = arith.constant 0 : i32
    %c0_i32_1 = arith.constant 0 : i32
    return %c0_i32, %c0_i32_0 : i32, i32
  }
  func.func @transform_9(%arg0: i32) -> (i32, i32) {
    %c0_i32 = arith.constant 0 : i32
    %c0_i32_0 = arith.constant 0 : i32
    %c0_i32_1 = arith.constant 0 : i32
    return %c0_i32, %c0_i32_0 : i32, i32
  }
  func.func @transform_10(%arg0: i32) -> (i32, i32) {
    %c0_i32 = arith.constant 0 : i32
    %c0_i32_0 = arith.constant 0 : i32
    %c0_i32_1 = arith.constant 0 : i32
    return %c0_i32, %c0_i32_0 : i32, i32
  }
  func.func @transform_11(%arg0: i32) -> (i32, i32, i32) {
    %c0_i32 = arith.constant 0 : i32
    %c0_i32_0 = arith.constant 0 : i32
    %c0_i32_1 = arith.constant 0 : i32
    return %arg0, %c0_i32, %c0_i32_0 : i32, i32, i32
  }
}

</mosaic_0001>

<bundles_post_ra>
// kernel: tpu_custom_call.1
= control target key start
LH: loop header
LB: loop body
LE: loop exit
PB: predicated region body
PF: predicated region fallthrough
CT: control target
= control target key end

     0   :  { %s918_s0 = inlined_call_operand.vmem [shape: f32[8,32], index: 0, kind: input, shape index: {}]   ;;  %s919_s1 = inlined_call_operand.vmem [shape: f32[8,64], index: 1, kind: input, shape index: {}]   ;;  %s920_s2 = inlined_call_operand.vmem [shape: f32[8,64], index: 2, kind: input, shape index: {}]   ;;  %s921_s3 = inlined_call_operand.vmem [shape: f32[64,32], index: 3, kind: input, shape index: {}]   ;;  %s922_s4 = inlined_call_operand.vmem [shape: f32[1,32], index: 4, kind: input, shape index: {}]   ;;  %s923_s5 = inlined_call_operand.vmem [shape: f32[96,32], index: 5, kind: input, shape index: {}]   ;;  %s924_s6 = inlined_call_operand.vmem [shape: f32[1,32], index: 6, kind: input, shape index: {}]   ;;  %s925_s7 = inlined_call_operand.vmem [shape: f32[32,16], index: 7, kind: input, shape index: {}]   ;;  %s926_s8 = inlined_call_operand.vmem [shape: f32[1,16], index: 8, kind: input, shape index: {}]   ;;  %s927_s9 = inlined_call_operand.vmem [shape: f32[1,16], index: 9, kind: input, shape index: {}]   ;;  %s928_s10 = inlined_call_operand.<no memory space> [shape: f32[1,1], index: 10, kind: input, shape index: {}]   ;;  %s929_s11 = inlined_call_operand.hbm [shape: f32[1,1,8], index: 11, kind: output, shape index: {}]  }
   0x1   :  { %v16_v0 = vstv %s928_s10 }
   0x2   :  { %17 = vst [vmem:[#allocation2] sm:$0x1] %v16_v0 }
   0x3   :  { %v42_v1 = vld [vmem:[%s921_s3] sm:$0xff]  ;;  %v43_v2 = vld [vmem:[%s921_s3 + $0x8] sm:$0xff]  ;;  %v44_v3 = vld [vmem:[%s921_s3 + $0x10] sm:$0xff]  ;;  %v711_v4 = vmov 0.0|0.0   ;;  %vm712_vm0 = vmmov 0   ;;  %v713_v7 = vmov 0.0  }
   0x4   :  { %630 = vmatprep.subr.bf16.mxu0 %v711_v4  ;;  %v631_v5 = vpack.c.bf16 %v43_v2, %v42_v1  ;;  %642 = vmatprep.subr.bf16.mxu1 %v711_v4  ;;  %v45_v6 = vld [vmem:[%s921_s3 + $0x18] sm:$0xff] }
   0x5   :  { %565 = vmatprep.mubr.msk.f32.mxu0 %vm712_vm0, %v713_v7  ;;  %584 = vmatprep.mubr.msk.f32.mxu1 %vm712_vm0, %v713_v7  ;;  %v634_v8 = vpack.c.bf16 %v45_v6, %v44_v3 }
   0x6   :  { %632 = vmatpush3.bf16.msra.mxu0 %v631_v5  ;;  %644 = vmatpush3.bf16.msra.mxu1 %v631_v5 }
   0x7   :  { %18 = vsyncpa [#allocation4], 0  ;;  %633 = vmatprep.subr.bf16.mxu0 %v711_v4  ;;  %645 = vmatprep.subr.bf16.mxu1 %v711_v4  ;;  %v46_v9 = vld [vmem:[%s921_s3 + $0x20] sm:$0xff]  ;;  %v47_v10 = vld [vmem:[%s921_s3 + $0x28] sm:$0xff]  ;;  %vm57_vm1 = vcmask 523264   ;;  %s715_s23 = smov 64  }
   0x8   :  { %v637_v11 = vpack.c.bf16 %v47_v10, %v46_v9  ;;  %v48_v12 = vld [vmem:[%s921_s3 + $0x30] sm:$0xff]  ;;  %v49_v13 = vld [vmem:[%s921_s3 + $0x38] sm:$0xff]  ;;  %v41_v15 = vld [vmem:[%s919_s1] sm:$0xff]  ;;  %vm216_vm2 = vcmask 261120   ;;  %vm238_vm3 = vcmask 785408   ;;  %v716_v61 = vmov 0  }
   0x9   :  { %v640_v14 = vpack.c.bf16 %v49_v13, %v48_v12  ;;  %v132_v16 = vld [vmem:[%s920_s2] sm:$0xff]  ;;  %v220_v18 = vld [vmem:[%s923_s5 + $0x8] sm:$0xff]  ;;  %v221_v19 = vld [vmem:[%s923_s5 + $0x10] sm:$0xff]  ;;  %685 = vset.pattern.permute.xlu1 %v716_v61  ;;  %686 = vset.pattern.permute.xlu0 %v716_v61  ;;  %vm409_vm4 = vcmask 130048   ;;  %s717_s12 = smov [#allocation3]   ;;  %vm486_vm5 = vcmask 57344  }
   0xa   :  { %635 = vmatpush3.bf16.msra.mxu0 %v634_v8  ;;  %647 = vmatpush3.bf16.msra.mxu1 %v634_v8  ;;  %v219_v17 = vld [vmem:[%s923_s5] sm:$0xff]  ;;  %v222_v21 = vld [vmem:[%s923_s5 + $0x18] sm:$0xff]  ;;  %v224_v24 = vld [vmem:[%s923_s5 + $0x28] sm:$0xff]  ;;  %s494_s13 = sshll.u32 %s717_s12, 4  ;;  %s495_s13 = int_to_ptr.vmem [resolvable:$true] %s494_s13 }
   0xb   :  { %636 = vmatprep.subr.bf16.mxu0 %v711_v4  ;;  %648 = vmatprep.subr.bf16.mxu1 %v711_v4  ;;  %v655_v20 = vpack.c.bf16 %v220_v18, %v219_v17  ;;  %v658_v22 = vpack.c.bf16 %v222_v21, %v221_v19  ;;  %v223_v23 = vld [vmem:[%s923_s5 + $0x20] sm:$0xff]  ;;  %v225_v26 = vld [vmem:[%s923_s5 + $0x30] sm:$0xff]  ;;  %v226_v27 = vld [vmem:[%s923_s5 + $0x38] sm:$0xff]  ;;  %s691_s14 = scalar_lea.vmem %s495_s13, 32  ;;  %p692_p1 = scmp.lt.s32.totalorder %s495_s13, %s495_s13 }
   0xc   :  { %v661_v25 = vpack.c.bf16 %v224_v24, %v223_v23  ;;  %v664_v28 = vpack.c.bf16 %v226_v27, %v225_v26  ;;  %v227_v29 = vld [vmem:[%s923_s5 + $0x40] sm:$0xff]  ;;  %v228_v30 = vld [vmem:[%s923_s5 + $0x48] sm:$0xff]  ;;  %v229_v32 = vld [vmem:[%s923_s5 + $0x50] sm:$0xff] }
   0xd   :  { %v667_v31 = vpack.c.bf16 %v228_v30, %v227_v29  ;;  %v230_v33 = vld [vmem:[%s923_s5 + $0x58] sm:$0xff]  ;;  %v313_v35 = vld [vmem:[%s925_s7] sm:$0xff]  ;;  %v314_v36 = vld [vmem:[%s925_s7 + $0x8] sm:$0xff]  ;;  %s714_s5 = smov 32  }
   0xe   :  { %638 = vmatpush3.bf16.msra.mxu0 %v637_v11  ;;  %650 = vmatpush3.bf16.msra.mxu1 %v637_v11  ;;  %v670_v34 = vpack.c.bf16 %v230_v33, %v229_v32  ;;  %v502_v37 = vld [vmem:[%s922_s4] ss:$0 sm:$0xff]  ;;  %v673_v38 = vpack.c.bf16 %v314_v36, %v313_v35  ;;  %v315_v52 = vld [vmem:[%s925_s7 + $0x10] sm:$0xff]  ;;  %v316_v53 = vld [vmem:[%s925_s7 + $0x18] sm:$0xff] }
   0xf   :  { %639 = vmatprep.subr.bf16.mxu0 %v711_v4  ;;  %651 = vmatprep.subr.bf16.mxu1 %v711_v4  ;;  %v207_v48 = vld [vmem:[%s918_s0] sm:$0xff]  ;;  %v676_v54 = vpack.c.bf16 %v316_v53, %v315_v52 }
  0x10   :  { %v505_v55 = vld [vmem:[%s924_s6] ss:$0 sm:$0xff] }
  0x11   :  { %v399_v60 = vld [vmem:[#allocation2] sm:$0x1] }
  0x12   :  { %641 = vmatpush3.bf16.msra.mxu0 %v640_v14  ;;  %653 = vmatpush3.bf16.msra.mxu1 %v640_v14  ;;  %v507_v62 = vld [vmem:[%s926_s8] ss:$0 sm:$0xff]  ;;  %s687_s8 = scalar_lea.vmem %s495_s13, 16 }
  0x13   :  { %654 = vmatprep.subr.bf16.mxu0 %v711_v4  ;;  %672 = vmatprep.subr.bf16.mxu1 %v711_v4  ;;  %v398_v3 = vld [vmem:[%s927_s9] sm:$0x1]  ;;  %p688_p0 = scmp.ne.s32.totalorder %s495_s13, %s687_s8  ;;  %p693_p2 = scmp.lt.s32.totalorder %s691_s14, %s687_s8 }
  0x14   :  { %402 = vperm.xlu1 %685, %v399_v60  }
  0x15   :  { %566 = vmatmul.mubr.msk.f32.vlgmr.msra.gmra.mrb[0].mxu0 %vm57_vm1, %v41_v15  ;;  %585 = vmatmul.mubr.msk.f32.vlgmr.msra.gmra.mrb[0].mxu1 %vm57_vm1, %v132_v16  ;;  %p694_p3 = por %p693_p2, %p692_p1 }
  0x16   :  { %611 = vmatprep.mubr.msk.f32.mxu0 %vm712_vm0, %v713_v7  ;;  %622 = vmatprep.mubr.msk.f32.mxu1 %vm712_vm0, %v713_v7 }
  0x17   :  { %656 = vmatpush3.bf16.msra.mxu0 %v655_v20  ;;  %674 = vmatpush3.bf16.msra.mxu1 %v673_v38  ;;  %p695_p4 = pnand %p694_p3, %p688_p0 }
  0x18   :  { %657 = vmatprep.subr.bf16.mxu0 %v711_v4  ;;  %675 = vmatprep.subr.bf16.mxu1 %v711_v4 }
  0x1b   :  { %659 = vmatpush3.bf16.msra.mxu0 %v658_v22  ;;  %677 = vmatpush3.bf16.msra.mxu1 %v676_v54 }
  0x1c   :  { %660 = vmatprep.subr.bf16.mxu0 %v711_v4  ;;  %625 = vmatprep.subr.mxu1 %v713_v7 }
  0x1f   :  { %662 = vmatpush3.bf16.msra.mxu0 %v661_v25 }
  0x20   :  { %663 = vmatprep.subr.bf16.mxu0 %v711_v4 }
  0x23   :  { %665 = vmatpush3.bf16.msra.mxu0 %v664_v28 }
  0x24   :  { %666 = vmatprep.subr.bf16.mxu0 %v711_v4 }
  0x27   :  { %668 = vmatpush3.bf16.msra.mxu0 %v667_v31 }
  0x28   :  { %669 = vmatprep.subr.bf16.mxu0 %v711_v4  ;;  %v405_v4 = vlaneseq }
  0x2a   :  { %v406_v5 = vshrl.u32 %v405_v4, 7 }
  0x2b   :  { %671 = vmatpush3.bf16.msra.mxu0 %v670_v34 }
  0x2c   :  { %v407_v6 = vsub.s32 0, %v406_v5 }
  0xe8   :  { %v127_v39 = vpop.f32.mrb[0].mxu0  ;;  %v202_v40 = vpop.f32.mrb[0].mxu1 }
  0xe9   :  { %v128_v41 = vadd.f32 %v502_v37, %v127_v39  ;;  %v567_v42 = vpop.f32.mrb[1].mxu0  ;;  %v203_v43 = vadd.f32 %v502_v37, %v202_v40  ;;  %v586_v44 = vpop.f32.mrb[1].mxu1 }
  0xeb   :  { %v131_v45 = vmax.f32 %v128_v41, 0.0  ;;  %v206_v46 = vmax.f32 %v203_v43, 0.0 }
  0xed   :  { %209 = vrot.lane.b32.xlu0 %v131_v45, %s714_s5 }
  0xf1   :  { %213 = vrot.lane.b32.xlu0 %v206_v46, %s715_s23 }
 0x15f   :  { %v210_v47 = vpop.permute.xlu0 %209 }
 0x160   :  { %v217_v49 = vsel %vm216_vm2, %v207_v48, %v210_v47 }
 0x163   :  { %v214_v50 = vpop.permute.xlu0 %213 }
 0x164   :  { %v218_v51 = vsel %vm57_vm1, %v217_v49, %v214_v50 }
 0x165   :  { %612 = vmatmul.mubr.msk.f32.vlgmr.msra.gmra.mrb[2].mxu0 %vm238_vm3, %v218_v51 }
 0x238   :  { %v308_v56 = vpop.f32.mrb[2].mxu0 }
 0x239   :  { %v309_v57 = vadd.f32 %v505_v55, %v308_v56  ;;  %v613_v58 = vpop.f32.mrb[3].mxu0 }
 0x23b   :  { %v312_v59 = vmax.f32 %v309_v57, 0.0 }
 0x23d   :  { %623 = vmatmul.mubr.msk.f32.vlgmr.msra.gmra.mrb[2].mxu1 %vm216_vm2, %v312_v59 }
 0x23e   :  { %627 = vmatprep.mubr.msk.f32.mxu1 %vm712_vm0, %v713_v7  ;;  %v403_v7 = vpop.permute.xlu1 %402 }
 0x23f   :  { %v408_v8 = vrot.slane %v403_v7, %v407_v6 }
 0x310   :  { %v393_v63 = vpop.f32.mrb[2].mxu1 }
 0x311   :  { %v394_v0 = vadd.f32 %v507_v62, %v393_v63  ;;  %v624_v1 = vpop.f32.mrb[3].mxu1 }
 0x313   :  { %v397_v2 = vmax.f32 %v394_v0, 0.0 }
 0x315   :  { %626 = vmatpush3.xpose.msk.msra.mxu1 %vm409_vm4, %v397_v2 }
 0x318   :  { %628 = vmatmul.mubr.msk.f32.vlgmr.msra.gmra.mrb[4].mxu1 %vm409_vm4, %v398_v3 }
 0x3eb   :  { %v482_v9 = vpop.f32.mrb[4].mxu1 }
 0x3ec   :  { %v483_v10 = vadd.f32 %v482_v9, %v408_v8  ;;  %v629_v11 = vpop.f32.mrb[5].mxu1 }
 0x3ee   :  { %487 = vst.msk [vmem:[#allocation3] sm:$0x1] %vm486_vm5, %v483_v10 }
 0x3ef   :  { %698 = shalt.err (!%p695_p4)
}
 0x3f0   :  { %s699_s16 = scalar_lea.hbm %s929_s11, 16 }
 0x3f1   :  { %p700_p5 = scmp.ne.s32.totalorder %s929_s11, %s699_s16  ;;  %p703_p6 = scmp.lt.u32.totalorder %s699_s16, %s929_s11 }
 0x3f3   :  { %p705_p7 = pnand %p703_p6, %p700_p5 }
 0x3f5   :  { %708 = shalt.err (!%p705_p7)
}
 0x3f6   :  { %497 = dma.vmem_to_hbm [thread:$0]  %s495_s13, 16, %s929_s11, [#allocation4]  }
 0x3f7   :  { %709 = dma.done.wait [#allocation4], 16  }
 0x3f8   :  { %710 = vsyncadd [#allocation4], 4294967280 }
 0x3f9   :  { %501 = vsyncpa [#allocation4], 1 }

</bundles_post_ra>
